<compile_context>
chip_gen: v6e
topology: v6e:2x2x1
jax: 0.10.0
libtpu: 0.0.40
codegen_flags: <defaults>
</compile_context>

<pallas_src>
import functools

import jax
import jax.numpy as jnp
from jax.experimental import pallas as pl
from jax.experimental.pallas import tpu as pltpu


def _round_up(n, m):
    return ((n + m - 1) // m) * m


def _proxy_anchor_kernel(x_ref, label_ref, p_ref, out_ref, *,
                         mrg, alpha, nb_classes, tile_c, mxu_dtype):
    blk = pl.program_id(0)

    x = x_ref[...].astype(jnp.float32)        # (B, Dp)  resident across blocks
    p = p_ref[...].astype(jnp.float32)        # (TILE_C, Dp) streamed per block
    labels = label_ref[...]                   # (B, 1) int32

    b = x.shape[0]

    # l2_norm along the embedding dim (dim=1 in the PyTorch reference).
    # Zero-padded D columns contribute exactly 0 to the sums.
    x_n = x * jax.lax.rsqrt(jnp.sum(x * x, axis=1, keepdims=True))
    p_n = p * jax.lax.rsqrt(jnp.sum(p * p, axis=1, keepdims=True))

    # cos = l2_norm(X) @ l2_norm(P).T, expressed transpose-free: contract the
    # embedding dim of both operands directly on the MXU, f32 accumulation.
    cos = jax.lax.dot_general(
        x_n.astype(mxu_dtype), p_n.astype(mxu_dtype),
        dimension_numbers=(((1,), (1,)), ((), ())),
        preferred_element_type=jnp.float32)   # (B, TILE_C)

    # In-kernel one-hot: global class index of each column vs. the row label.
    class_idx = blk * tile_c + jax.lax.broadcasted_iota(jnp.int32, (b, tile_c), 1)
    pos_mask = (class_idx == labels).astype(jnp.float32)        # (B, TILE_C)
    class_valid = (class_idx < nb_classes).astype(jnp.float32)  # mask padded cols

    # Positive branch: exactly one positive per row -> gather its cosine,
    # exp() on B values only (EUP), scatter back per class via the mask (VALU).
    row_pos_cos = jnp.sum(pos_mask * cos, axis=1, keepdims=True)        # (B, 1)
    row_has_pos = jnp.sum(pos_mask, axis=1, keepdims=True)              # (B, 1)
    row_pos_exp = jnp.exp(-alpha * (row_pos_cos - mrg)) * row_has_pos   # (B, 1)
    p_sim_sum = jnp.sum(pos_mask * row_pos_exp, axis=0, keepdims=True)  # (1, TILE_C)

    # Negative branch: full exp over the block; negative mask = valid - positive
    # (single subtract + multiply, no compare/select, padded classes excluded).
    neg_exp = jnp.exp(alpha * (cos + mrg))
    n_sim_sum = jnp.sum((class_valid - pos_mask) * neg_exp,
                        axis=0, keepdims=True)                          # (1, TILE_C)

    pos_log = jnp.sum(jnp.log1p(p_sim_sum), axis=1, keepdims=True)      # (1, 1)
    neg_log = jnp.sum(jnp.log1p(n_sim_sum), axis=1, keepdims=True)      # (1, 1)
    valid_cnt = jnp.sum(
        (jnp.sum(pos_mask, axis=0, keepdims=True) > 0.0).astype(jnp.float32),
        axis=1, keepdims=True)                                          # (1, 1)

    # Pack the three per-block partial scalars into one lane-dense (8, 128)
    # tile (rows 1..7 are zero) so the output store is a single unmasked vst
    # and the class-block grid axis can remain "parallel" (v7x megacore).
    ridx = jax.lax.broadcasted_iota(jnp.int32, (8, 128), 0)
    cidx = jax.lax.broadcasted_iota(jnp.int32, (8, 128), 1)
    row0 = ridx == 0
    tile = jnp.where(row0 & (cidx == 0), pos_log, 0.0)
    tile = jnp.where(row0 & (cidx == 1), neg_log, tile)
    tile = jnp.where(row0 & (cidx == 2), valid_cnt, tile)
    out_ref[...] = tile


def proxy_anchor_loss(x, label, proxies, *, nb_classes, mrg=0.1, alpha=32.0,
                      tile_c=2048, mxu_dtype=jnp.bfloat16):
    """Pallas implementation of Proxy_Anchor.forward(X, label, P).

    mxu_dtype=jnp.bfloat16 uses the full-rate bf16 MXU (recommended on
    v6e/v7x); mxu_dtype=jnp.float32 is bit-faithful to the fp32 PyTorch module.
    All elementwise / exp / log1p math stays in f32 either way.
    """
    b, d = x.shape
    c = proxies.shape[0]
    assert c == nb_classes
    assert label.shape[0] == b

    # Pad the embedding dim to a lane multiple (zeros: norms / dots unchanged).
    d_pad = _round_up(d, 128)
    if d_pad != d:
        x = jnp.pad(x, ((0, 0), (0, d_pad - d)))
        proxies = jnp.pad(proxies, ((0, 0), (0, d_pad - d)))

    # Clamp the class tile so the double-buffered proxy tile stays within a
    # ~16 MiB VMEM budget (safe for v5e/v6e/v7x), then pad the class dim to a
    # whole number of tiles.  Padded proxy rows are filled with ones (nonzero
    # norm, no NaNs from rsqrt); their contribution is masked out in-kernel.
    p_bytes = jnp.dtype(proxies.dtype).itemsize
    vmem_tile_budget = 16 * 1024 * 1024
    max_tile = max(128, (vmem_tile_budget // (2 * d_pad * p_bytes)) // 128 * 128)
    tile_c = max(128, min(int(tile_c), max_tile, _round_up(c, 128)))
    c_pad = _round_up(c, tile_c)
    if c_pad != c:
        pad_rows = jnp.ones((c_pad - c, d_pad), proxies.dtype)
        proxies = jnp.concatenate([proxies, pad_rows], axis=0)

    num_blocks = c_pad // tile_c
    label2d = label.astype(jnp.int32).reshape(b, 1)

    kernel = functools.partial(
        _proxy_anchor_kernel,
        mrg=float(mrg), alpha=float(alpha), nb_classes=int(nb_classes),
        tile_c=int(tile_c), mxu_dtype=mxu_dtype)

    partials = pl.pallas_call(
        kernel,
        out_shape=jax.ShapeDtypeStruct((num_blocks * 8, 128), jnp.float32),
        grid_spec=pltpu.PrefetchScalarGridSpec(
            num_scalar_prefetch=0,
            grid=(num_blocks,),
            in_specs=[
                pl.BlockSpec((b, d_pad), lambda i: (0, 0)),       # X (stays resident)
                pl.BlockSpec((b, 1), lambda i: (0, 0)),           # labels (int32)
                pl.BlockSpec((tile_c, d_pad), lambda i: (i, 0)),  # proxy class tile
            ],
            out_specs=pl.BlockSpec((8, 128), lambda i: (i, 0)),   # per-block partials
        ),
        compiler_params=pltpu.CompilerParams(
            dimension_semantics=("parallel",),      # shard class blocks over v7x TCs
            vmem_limit_bytes=48 * 1024 * 1024,      # > 16/32 MiB defaults, < v7x 64 MiB
        ),
    )(x, label2d, proxies)

    # Tiny final reduction in plain JAX.  Rows 1..7 of every (8, 128) block
    # tile are zero, so plain column sums suffice (no strided gather).
    pos_log = jnp.sum(partials[:, 0])
    neg_log = jnp.sum(partials[:, 1])
    num_valid = jnp.sum(partials[:, 2])
    return pos_log / num_valid + neg_log / jnp.float32(nb_classes)


def proxy_anchor_loss_ref(x, label, proxies, *, nb_classes, mrg=0.1, alpha=32.0):
    """Pure-JAX f32 reference (mirrors the PyTorch module) for validation."""
    x_n = x / jnp.linalg.norm(x, axis=1, keepdims=True)
    p_n = proxies / jnp.linalg.norm(proxies, axis=1, keepdims=True)
    cos = x_n @ p_n.T
    one = jax.nn.one_hot(label, nb_classes, dtype=jnp.float32)
    pos_exp = jnp.exp(-alpha * (cos - mrg))
    neg_exp = jnp.exp(alpha * (cos + mrg))
    p_sim = jnp.sum(jnp.where(one == 1.0, pos_exp, 0.0), axis=0)
    n_sim = jnp.sum(jnp.where(one == 0.0, neg_exp, 0.0), axis=0)
    num_valid = jnp.sum((one.sum(axis=0) != 0).astype(jnp.float32))
    pos_term = jnp.sum(jnp.log1p(p_sim)) / num_valid
    neg_term = jnp.sum(jnp.log1p(n_sim)) / nb_classes
    return pos_term + neg_term


if __name__ == "__main__":
    key = jax.random.PRNGKey(0)

    # --- Test 1: small, module-consistent shapes: batch=8, embed=32, classes=8,
    # two samples per class in the first 4 classes (so num_valid_proxies=4 !=
    # nb_classes, exercising the nonzero-proxy counting path). ---
    nb_classes = 8
    sz_embed = 32
    batch = 8

    kx, kp, kx2, kp2 = jax.random.split(key, 4)
    X = jax.random.normal(kx, (batch, sz_embed), dtype=jnp.float32)
    # Deterministic proxy "parameters" (in real training: nn.Parameter of shape
    # (nb_classes, sz_embed) initialized e.g. with kaiming_normal_).
    P = jax.random.normal(kp, (nb_classes, sz_embed), dtype=jnp.float32)
    label = jnp.array([0, 0, 1, 1, 2, 2, 3, 3], dtype=jnp.int32)

    ref = proxy_anchor_loss_ref(X, label, P, nb_classes=nb_classes, mrg=0.1, alpha=32.0)

    # f32 MXU path: bit-faithful to the fp32 PyTorch module -> tight tolerance.
    loss_f32 = proxy_anchor_loss(X, label, P, nb_classes=nb_classes, mrg=0.1,
                                 alpha=32.0, mxu_dtype=jnp.float32)
    loss_f32 = jax.block_until_ready(loss_f32)
    assert jnp.allclose(loss_f32, ref, rtol=1e-5, atol=1e-5), (loss_f32, ref)

    # bf16 MXU path (production setting for v6e/v7x): alpha=32 amplifies the
    # bf16 rounding of cos through exp(), so compare at a looser tolerance.
    loss_bf16 = proxy_anchor_loss(X, label, P, nb_classes=nb_classes, mrg=0.1,
                                  alpha=32.0, mxu_dtype=jnp.bfloat16)
    loss_bf16 = jax.block_until_ready(loss_bf16)
    assert jnp.allclose(loss_bf16, ref, rtol=5e-2, atol=5e-2), (loss_bf16, ref)

    # --- Test 2: forces multi-block class tiling (tile_c=128, C=300 -> 3 blocks)
    # and non-multiple-of-128 embedding padding (D=96). ---
    nb2, d2, b2 = 300, 96, 24
    X2 = jax.random.normal(kx2, (b2, d2), dtype=jnp.float32)
    P2 = jax.random.normal(kp2, (nb2, d2), dtype=jnp.float32)
    label2 = (jnp.arange(b2, dtype=jnp.int32) % 7) * 37  # only 7 valid proxies

    ref2 = proxy_anchor_loss_ref(X2, label2, P2, nb_classes=nb2, mrg=0.1, alpha=32.0)
    loss2 = proxy_anchor_loss(X2, label2, P2, nb_classes=nb2, mrg=0.1,
                              alpha=32.0, tile_c=128, mxu_dtype=jnp.float32)
    loss2 = jax.block_until_ready(loss2)
    assert jnp.allclose(loss2, ref2, rtol=1e-5, atol=1e-5), (loss2, ref2)

    print("KERNEL_OK")
</pallas_src>

<mosaic_0001>
module attributes {stable_mosaic.version = 11 : i64} {
  func.func @_proxy_anchor_kernel(%arg0: i32, %arg1: memref<8x128xf32, #tpu.memory_space<vmem>>, %arg2: memref<8x1xi32, #tpu.memory_space<vmem>>, %arg3: memref<128x128xf32, #tpu.memory_space<vmem>>, %arg4: memref<8x128xf32, #tpu.memory_space<vmem>>) attributes {dimension_semantics = [#tpu.dimension_semantics<parallel>], iteration_bounds = array<i64: 1>, scalar_prefetch = 0 : i64, scratch_operands = 0 : i64, tpu.core_type = #tpu.core_type<tc>, window_params = [{pipeline_mode = #tpu.pipeline_mode<synchronous>, transform_indices = @transform_0, window_bounds = array<i64: 8, 128>}, {pipeline_mode = #tpu.pipeline_mode<synchronous>, transform_indices = @transform_1, window_bounds = array<i64: 8, 1>}, {transform_indices = @transform_2, window_bounds = array<i64: 128, 128>}, {transform_indices = @transform_3, window_bounds = array<i64: 8, 128>}]} {
    %c0 = arith.constant 0 : index
    %c0_0 = arith.constant 0 : index
    %0 = vector.load %arg1[%c0, %c0_0] : memref<8x128xf32, #tpu.memory_space<vmem>>, vector<8x128xf32>
    %c0_1 = arith.constant 0 : index
    %c0_2 = arith.constant 0 : index
    %1 = vector.load %arg3[%c0_1, %c0_2] : memref<128x128xf32, #tpu.memory_space<vmem>>, vector<128x128xf32>
    %c0_3 = arith.constant 0 : index
    %c0_4 = arith.constant 0 : index
    %2 = vector.load %arg2[%c0_3, %c0_4] : memref<8x1xi32, #tpu.memory_space<vmem>>, vector<8x1xi32>
    %3 = arith.mulf %0, %0 : vector<8x128xf32>
    %cst = arith.constant dense<0.000000e+00> : vector<8xf32>
    %4 = vector.multi_reduction <add>, %3, %cst [1] : vector<8x128xf32> to vector<8xf32>
    %5 = vector.shape_cast %4 : vector<8xf32> to vector<8x1xf32>
    %6 = math.rsqrt %5 : vector<8x1xf32>
    %7 = vector.broadcast %6 : vector<8x1xf32> to vector<8x128xf32>
    %8 = arith.mulf %0, %7 : vector<8x128xf32>
    %9 = arith.mulf %1, %1 : vector<128x128xf32>
    %cst_5 = arith.constant dense<0.000000e+00> : vector<128xf32>
    %10 = vector.multi_reduction <add>, %9, %cst_5 [1] : vector<128x128xf32> to vector<128xf32>
    %11 = vector.shape_cast %10 : vector<128xf32> to vector<128x1xf32>
    %12 = math.rsqrt %11 : vector<128x1xf32>
    %13 = vector.broadcast %12 : vector<128x1xf32> to vector<128x128xf32>
    %14 = arith.mulf %1, %13 : vector<128x128xf32>
    %cst_6 = arith.constant dense<0.000000e+00> : vector<8x128xf32>
    %15 = tpu.matmul %8, %14, %cst_6 {dimension_numbers = #tpu.dot_dimension_numbers<[1], [1], [0], [0], [0, 0, 1, 0], [], []>} : vector<8x128xf32>, vector<128x128xf32>, vector<8x128xf32> -> vector<8x128xf32>
    %c128_i32 = arith.constant 128 : i32
    %16 = arith.muli %arg0, %c128_i32 : i32
    %17 = tpu.iota {dimensions = array<i32: 1>} : vector<8x128xi32>
    %18 = vector.broadcast %16 : i32 to vector<8x128xi32>
    %19 = arith.addi %18, %17 : vector<8x128xi32>
    %20 = vector.broadcast %2 : vector<8x1xi32> to vector<8x128xi32>
    %21 = arith.cmpi eq, %19, %20 : vector<8x128xi32>
    %22 = arith.extui %21 : vector<8x128xi1> to vector<8x128xi32>
    %23 = arith.sitofp %22 : vector<8x128xi32> to vector<8x128xf32>
    %c8_i32 = arith.constant 8 : i32
    %24 = vector.broadcast %c8_i32 : i32 to vector<8x128xi32>
    %25 = arith.cmpi slt, %19, %24 : vector<8x128xi32>
    %26 = arith.extui %25 : vector<8x128xi1> to vector<8x128xi32>
    %27 = arith.sitofp %26 : vector<8x128xi32> to vector<8x128xf32>
    %28 = arith.mulf %23, %15 : vector<8x128xf32>
    %cst_7 = arith.constant dense<0.000000e+00> : vector<8xf32>
    %29 = vector.multi_reduction <add>, %28, %cst_7 [1] : vector<8x128xf32> to vector<8xf32>
    %30 = vector.shape_cast %29 : vector<8xf32> to vector<8x1xf32>
    %cst_8 = arith.constant dense<0.000000e+00> : vector<8xf32>
    %31 = vector.multi_reduction <add>, %23, %cst_8 [1] : vector<8x128xf32> to vector<8xf32>
    %32 = vector.shape_cast %31 : vector<8xf32> to vector<8x1xf32>
    %cst_9 = arith.constant 1.000000e-01 : f32
    %33 = vector.broadcast %cst_9 : f32 to vector<8x1xf32>
    %34 = arith.subf %30, %33 : vector<8x1xf32>
    %cst_10 = arith.constant -3.200000e+01 : f32
    %35 = vector.broadcast %cst_10 : f32 to vector<8x1xf32>
    %36 = arith.mulf %35, %34 : vector<8x1xf32>
    %37 = math.exp %36 : vector<8x1xf32>
    %38 = arith.mulf %37, %32 : vector<8x1xf32>
    %39 = vector.broadcast %38 : vector<8x1xf32> to vector<8x128xf32>
    %40 = arith.mulf %23, %39 : vector<8x128xf32>
    %cst_11 = arith.constant dense<0.000000e+00> : vector<128xf32>
    %41 = vector.multi_reduction <add>, %40, %cst_11 [0] : vector<8x128xf32> to vector<128xf32>
    %42 = vector.shape_cast %41 : vector<128xf32> to vector<1x128xf32>
    %cst_12 = arith.constant 1.000000e-01 : f32
    %43 = vector.broadcast %cst_12 : f32 to vector<8x128xf32>
    %44 = arith.addf %15, %43 : vector<8x128xf32>
    %cst_13 = arith.constant 3.200000e+01 : f32
    %45 = vector.broadcast %cst_13 : f32 to vector<8x128xf32>
    %46 = arith.mulf %45, %44 : vector<8x128xf32>
    %47 = math.exp %46 : vector<8x128xf32>
    %48 = arith.subf %27, %23 : vector<8x128xf32>
    %49 = arith.mulf %48, %47 : vector<8x128xf32>
    %cst_14 = arith.constant dense<0.000000e+00> : vector<128xf32>
    %50 = vector.multi_reduction <add>, %49, %cst_14 [0] : vector<8x128xf32> to vector<128xf32>
    %51 = vector.shape_cast %50 : vector<128xf32> to vector<1x128xf32>
    %52 = math.log1p %42 : vector<1x128xf32>
    %cst_15 = arith.constant dense<0.000000e+00> : vector<1xf32>
    %53 = vector.multi_reduction <add>, %52, %cst_15 [1] : vector<1x128xf32> to vector<1xf32>
    %54 = vector.shape_cast %53 : vector<1xf32> to vector<1x1xf32>
    %55 = math.log1p %51 : vector<1x128xf32>
    %cst_16 = arith.constant dense<0.000000e+00> : vector<1xf32>
    %56 = vector.multi_reduction <add>, %55, %cst_16 [1] : vector<1x128xf32> to vector<1xf32>
    %57 = vector.shape_cast %56 : vector<1xf32> to vector<1x1xf32>
    %cst_17 = arith.constant dense<0.000000e+00> : vector<128xf32>
    %58 = vector.multi_reduction <add>, %23, %cst_17 [0] : vector<8x128xf32> to vector<128xf32>
    %59 = vector.shape_cast %58 : vector<128xf32> to vector<1x128xf32>
    %cst_18 = arith.constant 0.000000e+00 : f32
    %60 = vector.broadcast %cst_18 : f32 to vector<1x128xf32>
    %61 = arith.cmpf ogt, %59, %60 : vector<1x128xf32>
    %62 = arith.extui %61 : vector<1x128xi1> to vector<1x128xi32>
    %63 = arith.sitofp %62 : vector<1x128xi32> to vector<1x128xf32>
    %cst_19 = arith.constant dense<0.000000e+00> : vector<1xf32>
    %64 = vector.multi_reduction <add>, %63, %cst_19 [1] : vector<1x128xf32> to vector<1xf32>
    %65 = vector.shape_cast %64 : vector<1xf32> to vector<1x1xf32>
    %66 = tpu.iota {dimensions = array<i32: 0>} : vector<8x128xi32>
    %67 = tpu.iota {dimensions = array<i32: 1>} : vector<8x128xi32>
    %c0_i32 = arith.constant 0 : i32
    %68 = vector.broadcast %c0_i32 : i32 to vector<8x128xi32>
    %69 = arith.cmpi eq, %66, %68 : vector<8x128xi32>
    %c0_i32_20 = arith.constant 0 : i32
    %70 = vector.broadcast %c0_i32_20 : i32 to vector<8x128xi32>
    %71 = arith.cmpi eq, %67, %70 : vector<8x128xi32>
    %72 = arith.andi %69, %71 : vector<8x128xi1>
    %cst_21 = arith.constant 0.000000e+00 : f32
    %73 = vector.shape_cast %54 : vector<1x1xf32> to vector<1x1xf32>
    %74 = vector.broadcast %73 : vector<1x1xf32> to vector<8x128xf32>
    %75 = vector.broadcast %cst_21 : f32 to vector<8x128xf32>
    %76 = arith.select %72, %74, %75 : vector<8x128xi1>, vector<8x128xf32>
    %c1_i32 = arith.constant 1 : i32
    %77 = vector.broadcast %c1_i32 : i32 to vector<8x128xi32>
    %78 = arith.cmpi eq, %67, %77 : vector<8x128xi32>
    %79 = arith.andi %69, %78 : vector<8x128xi1>
    %80 = vector.shape_cast %57 : vector<1x1xf32> to vector<1x1xf32>
    %81 = vector.broadcast %80 : vector<1x1xf32> to vector<8x128xf32>
    %82 = arith.select %79, %81, %76 : vector<8x128xi1>, vector<8x128xf32>
    %c2_i32 = arith.constant 2 : i32
    %83 = vector.broadcast %c2_i32 : i32 to vector<8x128xi32>
    %84 = arith.cmpi eq, %67, %83 : vector<8x128xi32>
    %85 = arith.andi %69, %84 : vector<8x128xi1>
    %86 = vector.shape_cast %65 : vector<1x1xf32> to vector<1x1xf32>
    %87 = vector.broadcast %86 : vector<1x1xf32> to vector<8x128xf32>
    %88 = arith.select %85, %87, %82 : vector<8x128xi1>, vector<8x128xf32>
    %c0_22 = arith.constant 0 : index
    %c0_23 = arith.constant 0 : index
    %89 = vector.load %arg4[%c0_22, %c0_23] : memref<8x128xf32, #tpu.memory_space<vmem>>, vector<8x128xf32>
    tpu.vector_store %arg4[%c0_22, %c0_23], %88 {strides = array<i32>} : memref<8x128xf32, #tpu.memory_space<vmem>>, vector<8x128xf32>,
    return
  }
  func.func @transform_0(%arg0: i32) -> (i32, i32) {
    %c0_i32 = arith.constant 0 : i32
    %c0_i32_0 = arith.constant 0 : i32
    %c0_i32_1 = arith.constant 0 : i32
    return %c0_i32, %c0_i32_0 : i32, i32
  }
  func.func @transform_1(%arg0: i32) -> (i32, i32) {
    %c0_i32 = arith.constant 0 : i32
    %c0_i32_0 = arith.constant 0 : i32
    %c0_i32_1 = arith.constant 0 : i32
    return %c0_i32, %c0_i32_0 : i32, i32
  }
  func.func @transform_2(%arg0: i32) -> (i32, i32) {
    %c0_i32 = arith.constant 0 : i32
    %c0_i32_0 = arith.constant 0 : i32
    return %arg0, %c0_i32 : i32, i32
  }
  func.func @transform_3(%arg0: i32) -> (i32, i32) {
    %c0_i32 = arith.constant 0 : i32
    %c0_i32_0 = arith.constant 0 : i32
    return %arg0, %c0_i32 : i32, i32
  }
}

</mosaic_0001>

<bundles_post_ra>
// kernel: tpu_custom_call.1
= control target key start
LH: loop header
LB: loop body
LE: loop exit
PB: predicated region body
PF: predicated region fallthrough
CT: control target
= control target key end

     0   :  { %8 = vsyncpa [#allocation3], 0  ;;  %s610_s0 = inlined_call_operand.vmem [shape: f32[8,128], index: 0, kind: input, shape index: {}]   ;;  %s611_s1 = inlined_call_operand.vmem [shape: s32[8,1], index: 1, kind: input, shape index: {}]   ;;  %s612_s2 = inlined_call_operand.hbm [shape: f32[128,128], index: 2, kind: input, shape index: {}]   ;;  %s613_s3 = inlined_call_operand.hbm [shape: f32[8,128], index: 3, kind: output, shape index: {}]  }
   0x1   :  { %9 = vsyncpa [#allocation4], 0  ;;  %s457_s12 = smov [#allocation2]  }
   0x2   :  { %s19_s13 = sshll.u32 %s457_s12, 4  ;;  %s20_s13 = int_to_ptr.vmem [resolvable:$true] %s19_s13 }
   0x3   :  { %s421_s14 = scalar_lea.vmem %s20_s13, 2048  ;;  %p426_p1 = scmp.lt.s32.totalorder %s20_s13, %s20_s13 }
   0x4   :  { %p422_p0 = scmp.ne.s32.totalorder %s20_s13, %s421_s14  ;;  %p427_p2 = scmp.lt.s32.totalorder %s421_s14, %s421_s14 }
   0x6   :  { %p428_p3 = por %p427_p2, %p426_p1 }
   0x8   :  { %p429_p4 = pnand %p428_p3, %p422_p0 }
   0xa   :  { %432 = shalt.err (!%p429_p4)
}
   0xb   :  { %s458_s15 = smov 128   ;;  %s459_s16 = smov 8  }
   0xc   :  { %25 = dma.hbm_to_vmem [thread:$0]  %s612_s2, 2048, %s20_s13, [#allocation3], %s458_s15, %s458_s15, %s459_s16  }
   0xd   :  { %453 = dma.done.wait [#allocation3], 2048  }
   0xe   :  { %454 = vsyncadd [#allocation3], 4294965248  ;;  %v487_v0 = vld [vmem:[#allocation2 + $0x78] sm:$0xff]  ;;  %v489_v1 = vld [vmem:[#allocation2 + $0x70] sm:$0xff]  ;;  %v460_v26 = vmov 0.0   ;;  %vm461_vm0 = vmmov 0  }
   0xf   :  { %v491_v2 = vld [vmem:[#allocation2 + $0x68] sm:$0xff]  ;;  %v67_v3 = vmul.f32 %v487_v0, %v487_v0  ;;  %v497_v5 = vld [vmem:[#allocation2 + $0x60] sm:$0xff]  ;;  %v66_v6 = vmul.f32 %v489_v1, %v489_v1  ;;  %v503_v8 = vld [vmem:[#allocation2 + $0x58] sm:$0xff]  ;;  %327 = vmatprep.subr.mxu0 %v460_v26  ;;  %359 = vmatprep.mubr.msk.f32.mxu0 %vm461_vm0, %v460_v26  ;;  %v462_v36 = vmov 0  }
  0x10   :  { %v65_v4 = vmul.f32 %v491_v2, %v491_v2  ;;  %v64_v7 = vmul.f32 %v497_v5, %v497_v5  ;;  %v505_v9 = vld [vmem:[#allocation2 + $0x50] sm:$0xff]  ;;  %v63_v10 = vmul.f32 %v503_v8, %v503_v8  ;;  %v511_v12 = vld [vmem:[#allocation2 + $0x48] sm:$0xff]  ;;  %v513_v13 = vld [vmem:[#allocation2 + $0x40] sm:$0xff]  ;;  %369 = vset.pattern.permute.xlu1 %v462_v36  ;;  %370 = vset.pattern.permute.xlu0 %v462_v36 }
  0x11   :  { %98 = vadd.xlane.f32.xlu0 %v67_v3  ;;  %v62_v11 = vmul.f32 %v505_v9, %v505_v9  ;;  %v61_v14 = vmul.f32 %v511_v12, %v511_v12  ;;  %v60_v15 = vmul.f32 %v513_v13, %v513_v13  ;;  %v519_v16 = vld [vmem:[#allocation2 + $0x38] sm:$0xff]  ;;  %v521_v17 = vld [vmem:[#allocation2 + $0x30] sm:$0xff]  ;;  %v527_v20 = vld [vmem:[#allocation2 + $0x28] sm:$0xff] }
  0x12   :  { %94 = vadd.xlane.f32.xlu1 %v65_v4  ;;  %v59_v18 = vmul.f32 %v519_v16, %v519_v16  ;;  %v58_v19 = vmul.f32 %v521_v17, %v521_v17  ;;  %v529_v21 = vld [vmem:[#allocation2 + $0x20] sm:$0xff]  ;;  %v57_v22 = vmul.f32 %v527_v20, %v527_v20  ;;  %v535_v24 = vld [vmem:[#allocation2 + $0x18] sm:$0xff]  ;;  %v537_v25 = vld [vmem:[#allocation2 + $0x10] sm:$0xff] }
  0x13   :  { %v56_v23 = vmul.f32 %v529_v21, %v529_v21  ;;  %v55_v27 = vmul.f32 %v535_v24, %v535_v24  ;;  %v54_v28 = vmul.f32 %v537_v25, %v537_v25  ;;  %v544_v29 = vld [vmem:[#allocation2 + $0x8] sm:$0xff]  ;;  %v546_v30 = vld [vmem:[#allocation2] sm:$0xff] }
  0x14   :  { %v53_v31 = vmul.f32 %v544_v29, %v544_v29  ;;  %v52_v32 = vmul.f32 %v546_v30, %v546_v30  ;;  %v555_v33 = vld [vmem:[%s610_s0] sm:$0xff]  ;;  %s463_s0 = smov [#allocation5]  }
  0x15   :  { %96 = vadd.xlane.f32.xlu0 %v66_v6  ;;  %v47_v34 = vmul.f32 %v555_v33, %v555_v33  ;;  %v46_v35 = vld [vmem:[%s611_s1] sm:$0xff]  ;;  %s297_s1 = sshll.u32 %s463_s0, 4  ;;  %s298_s1 = int_to_ptr.vmem [resolvable:$true] %s297_s1 }
  0x16   :  { %92 = vadd.xlane.f32.xlu1 %v64_v7  ;;  %s433_s22 = scalar_lea.vmem %s298_s1, 128  ;;  %p438_p6 = scmp.lt.s32.totalorder %s298_s1, %s298_s1 }
  0x17   :  { %p434_p5 = scmp.ne.s32.totalorder %s298_s1, %s433_s22  ;;  %p439_p7 = scmp.lt.s32.totalorder %s433_s22, %s433_s22 }
  0x19   :  { %90 = vadd.xlane.f32.xlu0 %v63_v10  ;;  %p440_p8 = por %p439_p7, %p438_p6 }
  0x1a   :  { %88 = vadd.xlane.f32.xlu1 %v62_v11 }
  0x1b   :  { %p441_p9 = pnand %p440_p8, %p434_p5 }
  0x1d   :  { %86 = vadd.xlane.f32.xlu0 %v61_v14 }
  0x1e   :  { %84 = vadd.xlane.f32.xlu1 %v60_v15 }
  0x21   :  { %82 = vadd.xlane.f32.xlu0 %v59_v18 }
  0x22   :  { %80 = vadd.xlane.f32.xlu1 %v58_v19 }
  0x25   :  { %78 = vadd.xlane.f32.xlu0 %v57_v22 }
  0x26   :  { %76 = vadd.xlane.f32.xlu1 %v56_v23 }
  0x29   :  { %74 = vadd.xlane.f32.xlu0 %v55_v27 }
  0x2a   :  { %72 = vadd.xlane.f32.xlu1 %v54_v28 }
  0x2d   :  { %70 = vadd.xlane.f32.xlu0 %v53_v31 }
  0x2e   :  { %68 = vadd.xlane.f32.xlu1 %v52_v32 }
  0x31   :  { %48 = vadd.xlane.f32.xlu0 %v47_v34 }
  0x3f   :  { %208 = vperm.xlu1 %369, %v46_v35  }
  0x9a   :  { %v99_v37 = vpop.xlane.xlu0 %98 }
  0x9b   :  { %v95_v38 = vpop.xlane.xlu1 %94  ;;  %371 = vrsqrt.f32 %v99_v37 }
  0x9c   :  { %373 = vrsqrt.f32 %v95_v38 }
  0x9e   :  { %v97_v39 = vpop.xlane.xlu0 %96 }
  0x9f   :  { %375 = vrsqrt.f32 %v97_v39  ;;  %v93_v40 = vpop.xlane.xlu1 %92 }
  0xa0   :  { %377 = vrsqrt.f32 %v93_v40 }
  0xa2   :  { %v91_v41 = vpop.xlane.xlu0 %90 }
  0xa3   :  { %379 = vrsqrt.f32 %v91_v41  ;;  %v89_v43 = vpop.xlane.xlu1 %88 }
  0xa4   :  { %381 = vrsqrt.f32 %v89_v43 }
  0xa6   :  { %v87_v47 = vpop.xlane.xlu0 %86 }
  0xa7   :  { %383 = vrsqrt.f32 %v87_v47  ;;  %v85_v51 = vpop.xlane.xlu1 %84 }
  0xa8   :  { %v372_v42 = vpop.eup %371  ;;  %385 = vrsqrt.f32 %v85_v51 }
  0xa9   :  { %v131_v44 = vmul.f32 %v372_v42, %v487_v0  ;;  %v374_v45 = vpop.eup %373 }
  0xaa   :  { %v129_v49 = vmul.f32 %v374_v45, %v491_v2  ;;  %v83_v54 = vpop.xlane.xlu0 %82 }
  0xab   :  { %328 = vmatpush3.xpose.msra.mxu0 %v131_v44  ;;  %387 = vrsqrt.f32 %v83_v54  ;;  %v81_v57 = vpop.xlane.xlu1 %80 }
  0xac   :  { %v376_v46 = vpop.eup %375  ;;  %329 = vmatprep.subr.mxu0 %v460_v26  ;;  %389 = vrsqrt.f32 %v81_v57 }
  0xad   :  { %v130_v48 = vmul.f32 %v376_v46, %v489_v1  ;;  %v378_v50 = vpop.eup %377 }
  0xae   :  { %v128_v52 = vmul.f32 %v378_v50, %v497_v5  ;;  %v79_v60 = vpop.xlane.xlu0 %78 }
  0xaf   :  { %330 = vmatpush3.xpose.msra.mxu0 %v130_v48  ;;  %391 = vrsqrt.f32 %v79_v60  ;;  %v77_v63 = vpop.xlane.xlu1 %76 }
  0xb0   :  { %331 = vmatprep.subr.mxu0 %v460_v26  ;;  %v380_v53 = vpop.eup %379  ;;  %393 = vrsqrt.f32 %v77_v63 }
  0xb1   :  { %v127_v55 = vmul.f32 %v380_v53, %v503_v8  ;;  %v382_v56 = vpop.eup %381 }
  0xb2   :  { %v126_v58 = vmul.f32 %v382_v56, %v505_v9  ;;  %v75_v2 = vpop.xlane.xlu0 %74 }
  0xb3   :  { %332 = vmatpush3.xpose.msra.mxu0 %v129_v49  ;;  %395 = vrsqrt.f32 %v75_v2  ;;  %v73_v5 = vpop.xlane.xlu1 %72 }
  0xb4   :  { %333 = vmatprep.subr.mxu0 %v460_v26  ;;  %v384_v59 = vpop.eup %383  ;;  %397 = vrsqrt.f32 %v73_v5 }
  0xb5   :  { %v125_v61 = vmul.f32 %v384_v59, %v511_v12  ;;  %v386_v62 = vpop.eup %385 }
  0xb6   :  { %v124_v0 = vmul.f32 %v386_v62, %v513_v13  ;;  %v71_v8 = vpop.xlane.xlu0 %70 }
  0xb7   :  { %334 = vmatpush3.xpose.msra.mxu0 %v128_v52  ;;  %399 = vrsqrt.f32 %v71_v8  ;;  %v69_v11 = vpop.xlane.xlu1 %68 }
  0xb8   :  { %335 = vmatprep.subr.mxu0 %v460_v26  ;;  %v388_v1 = vpop.eup %387  ;;  %401 = vrsqrt.f32 %v69_v11 }
  0xb9   :  { %v123_v3 = vmul.f32 %v388_v1, %v519_v16  ;;  %v390_v4 = vpop.eup %389 }
  0xba   :  { %v122_v6 = vmul.f32 %v390_v4, %v521_v17  ;;  %v49_v13 = vpop.xlane.xlu0 %48 }
  0xbb   :  { %336 = vmatpush3.xpose.msra.mxu0 %v127_v55  ;;  %403 = vrsqrt.f32 %v49_v13  ;;  %v209_v27 = vpop.permute.xlu1 %208 }
  0xbc   :  { %337 = vmatprep.subr.mxu0 %v460_v26  ;;  %v392_v7 = vpop.eup %391 }
  0xbd   :  { %v121_v9 = vmul.f32 %v392_v7, %v527_v20  ;;  %v394_v10 = vpop.eup %393 }
  0xbe   :  { %v120_v12 = vmul.f32 %v394_v10, %v529_v21 }
  0xbf   :  { %338 = vmatpush3.xpose.msra.mxu0 %v126_v58 }
  0xc0   :  { %339 = vmatprep.subr.mxu0 %v460_v26  ;;  %v396_v14 = vpop.eup %395 }
  0xc1   :  { %v119_v15 = vmul.f32 %v396_v14, %v535_v24  ;;  %v398_v16 = vpop.eup %397  ;;  %v203_v24 = vlaneseq }
  0xc2   :  { %v118_v17 = vmul.f32 %v398_v16, %v537_v25 }
  0xc3   :  { %340 = vmatpush3.xpose.msra.mxu0 %v125_v61  ;;  %v596_v25 = vand.u32 127, %v203_v24 }
  0xc4   :  { %341 = vmatprep.subr.mxu0 %v460_v26  ;;  %v400_v18 = vpop.eup %399 }
  0xc5   :  { %v117_v19 = vmul.f32 %v400_v18, %v544_v29  ;;  %v402_v20 = vpop.eup %401  ;;  %vm210_vm1 = vcmp.eq.s32.totalorder %v596_v25, %v209_v27  ;;  %vm213_vm3 = vcmp.lt.s32.totalorder %v596_v25, 8  ;;  %vm281_vm7 = vcmp.eq.s32.totalorder %v596_v25, 0 }
  0xc6   :  { %v116_v22 = vmul.f32 %v402_v20, %v546_v30  ;;  %v306_v28 = vsel %vm210_vm1, 1.0, %v460_v26  ;;  %v307_v43 = vsel %vm213_vm3, 1.0, %v460_v26  ;;  %vm284_vm8 = vcmp.eq.s32.totalorder %v596_v25, 1 }
  0xc7   :  { %342 = vmatpush3.xpose.msra.mxu0 %v124_v0  ;;  %v267_v29 = vrot.slane %v306_v28, 4  ;;  %v237_v47 = vsub.f32 %v307_v43, %v306_v28  ;;  %vm287_vm9 = vcmp.eq.s32.totalorder %v596_v25, 2 }
  0xc8   :  { %343 = vmatprep.subr.mxu0 %v460_v26  ;;  %v404_v21 = vpop.eup %403 }
  0xc9   :  { %v51_v23 = vmul.f32 %v404_v21, %v555_v33  ;;  %v268_v31 = vadd.f32 %v306_v28, %v267_v29 }
  0xcb   :  { %344 = vmatpush3.xpose.msra.mxu0 %v123_v3  ;;  %v269_v32 = vrot.slane %v268_v31, 2 }
  0xcc   :  { %345 = vmatprep.subr.mxu0 %v460_v26 }
  0xcd   :  { %v270_v34 = vadd.f32 %v269_v32, %v268_v31 }
  0xcf   :  { %346 = vmatpush3.xpose.msra.mxu0 %v122_v6  ;;  %v271_v30 = vrot.slane %v270_v34, 1 }
  0xd0   :  { %347 = vmatprep.subr.mxu0 %v460_v26 }
  0xd1   :  { %v272_v35 = vadd.f32 %v271_v30, %v270_v34 }
  0xd3   :  { %348 = vmatpush3.xpose.msra.mxu0 %v121_v9  ;;  %vm273_vm2 = vcmp.gt.f32.partialorder %v272_v35, 0.0 }
  0xd4   :  { %349 = vmatprep.subr.mxu0 %v460_v26  ;;  %v309_v33 = vsel %vm273_vm2, 1.0, %v460_v26 }
  0xd5   :  { %276 = vadd.xlane.f32.xlu1 %v309_v33 }
  0xd7   :  { %350 = vmatpush3.xpose.msra.mxu0 %v120_v12 }
  0xd8   :  { %351 = vmatprep.subr.mxu0 %v460_v26 }
  0xdb   :  { %352 = vmatpush3.xpose.msra.mxu0 %v119_v15 }
  0xdc   :  { %353 = vmatprep.subr.mxu0 %v460_v26 }
  0xdf   :  { %354 = vmatpush3.xpose.msra.mxu0 %v118_v17  ;;  %v279_v17 = vshrl.u32 %v203_v24, 7 }
  0xe0   :  { %355 = vmatprep.subr.mxu0 %v460_v26 }
  0xe1   :  { %vm280_vm6 = vcmp.eq.s32.totalorder %v279_v17, 0 }
  0xe2   :  { %vm282_vm10 = vmand %vm280_vm6, %vm281_vm7 }
  0xe3   :  { %356 = vmatpush3.xpose.msra.mxu0 %v117_v19  ;;  %vm285_vm11 = vmand %vm280_vm6, %vm284_vm8 }
  0xe4   :  { %357 = vmatprep.subr.mxu0 %v460_v26  ;;  %vm288_vm12 = vmand %vm280_vm6, %vm287_vm9 }
  0xe7   :  { %358 = vmatpush3.xpose.msra.mxu0 %v116_v22 }
  0xea   :  { %360 = vmatmul.mubr.f32.vlgmr.msra.gmra.mxu0 %v51_v23 }
 0x15e   :  { %v277_v21 = vpop.xlane.xlu1 %276 }
 0x1aa   :  { %v198_v36 = vpop.f32.mrf.mxu0 }
 0x1ab   :  { %v216_v37 = vmul.f32 %v306_v28, %v198_v36  ;;  %v233_v39 = vadd.f32 0.1, %v198_v36 }
 0x1ac   :  { %v361_v38 = vpop.f32.mrf.mxu0 }
 0x1ad   :  { %217 = vadd.xlane.f32.xlu0 %v216_v37  ;;  %v234_v40 = vmul.f32 32.0, %v233_v39 }
 0x1af   :  { %v235_v41 = vmul.f32 1.442695, %v234_v40 }
 0x1b1   :  { %219 = vadd.xlane.f32.xlu0 %v306_v28  ;;  %405 = vpow2.f32 %v235_v41 }
 0x1be   :  { %v406_v45 = vpop.eup %405 }
 0x1bf   :  { %v238_v49 = vmul.f32 %v406_v45, %v237_v47 }
 0x1c1   :  { %v239_v50 = vrot.slane %v238_v49, 4 }
 0x1c3   :  { %v240_v51 = vadd.f32 %v239_v50, %v238_v49 }
 0x1c5   :  { %v241_v52 = vrot.slane %v240_v51, 2 }
 0x1c7   :  { %v242_v56 = vadd.f32 %v241_v52, %v240_v51 }
 0x1c9   :  { %v243_v59 = vrot.slane %v242_v56, 1 }
 0x1cb   :  { %v244_v26 = vadd.f32 %v243_v59, %v242_v56 }
 0x1cd   :  { %v256_v0 = vadd.f32 1.0, %v244_v26  ;;  %v259_v5 = vmul.f32 -0.5, %v244_v26  ;;  %v262_v12 = vand.u32 2147483647, %v244_v26 }
 0x1cf   :  { %v260_v11 = vadd.f32 1.0, %v259_v5  ;;  %vm263_vm5 = vcmp.lt.f32.partialorder %v262_v12, 0.0004427343 }
 0x1d1   :  { %v261_v15 = vmul.f32 %v260_v11, %v244_v26 }
 0x236   :  { %v218_v42 = vpop.xlane.xlu0 %217 }
 0x237   :  { %v308_v44 = vadd.f32 -0.1, %v218_v42 }
 0x239   :  { %v222_v46 = vmul.f32 -32.0, %v308_v44 }
 0x23a   :  { %v220_v54 = vpop.xlane.xlu0 %219 }
 0x23b   :  { %v223_v48 = vmul.f32 1.442695, %v222_v46 }
 0x23d   :  { %407 = vpow2.f32 %v223_v48 }
 0x23e   :  { %409 = vlog2.f32 %v256_v0 }
 0x24a   :  { %v408_v53 = vpop.eup %407 }
 0x24b   :  { %v225_v55 = vmul.f32 %v408_v53, %v220_v54  ;;  %v410_v7 = vpop.eup %409 }
 0x24c   :  { %v258_v14 = vmul.f32 0.6931472, %v410_v7 }
 0x24d   :  { %v226_v57 = vmul.f32 %v306_v28, %v225_v55 }
 0x24e   :  { %v264_v16 = vsel %vm263_vm5, %v261_v15, %v258_v14 }
 0x24f   :  { %v227_v58 = vrot.slane %v226_v57, 4 }
 0x251   :  { %v228_v60 = vadd.f32 %v227_v58, %v226_v57 }
 0x253   :  { %v229_v61 = vrot.slane %v228_v60, 2 }
 0x255   :  { %v230_v62 = vadd.f32 %v229_v61, %v228_v60 }
 0x257   :  { %v231_v63 = vrot.slane %v230_v62, 1 }
 0x259   :  { %v232_v1 = vadd.f32 %v231_v63, %v230_v62 }
 0x25b   :  { %v245_v2 = vadd.f32 1.0, %v232_v1  ;;  %v248_v3 = vmul.f32 -0.5, %v232_v1  ;;  %v251_v6 = vand.u32 2147483647, %v232_v1 }
 0x25d   :  { %411 = vlog2.f32 %v245_v2  ;;  %v249_v4 = vadd.f32 1.0, %v248_v3  ;;  %vm252_vm4 = vcmp.lt.f32.partialorder %v251_v6, 0.0004427343 }
 0x25f   :  { %v250_v10 = vmul.f32 %v249_v4, %v232_v1 }
 0x26a   :  { %v412_v8 = vpop.eup %411 }
 0x26b   :  { %v247_v9 = vmul.f32 0.6931472, %v412_v8 }
 0x26d   :  { %v253_v13 = vsel %vm252_vm4, %v250_v10, %v247_v9 }
 0x26e   :  { %254 = vadd.xlane.f32.xlu0 %v253_v13 }
 0x272   :  { %265 = vadd.xlane.f32.xlu0 %v264_v16 }
 0x2f7   :  { %v255_v18 = vpop.xlane.xlu0 %254 }
 0x2f8   :  { %v283_v19 = vsel %vm282_vm10, %v255_v18, 0.0 }
 0x2fb   :  { %v266_v20 = vpop.xlane.xlu0 %265 }
 0x2fc   :  { %v286_v22 = vsel %vm285_vm11, %v266_v20, %v283_v19 }
 0x2fd   :  { %v289_v23 = vsel %vm288_vm12, %v277_v21, %v286_v22 }
 0x2fe   :  { %290 = vst [vmem:[#allocation5] sm:$0xff] %v289_v23 }
 0x2ff   :  { %444 = shalt.err (!%p441_p9)
}
 0x300   :  { %300 = dma.vmem_to_hbm [thread:$0]  %s298_s1, 128, %s613_s3, [#allocation4]  }
 0x301   :  { %455 = dma.done.wait [#allocation4], 128  }
 0x302   :  { %456 = vsyncadd [#allocation4], 4294967168 }
 0x303   :  { %304 = vsyncpa [#allocation3], 1 }
 0x304   :  { %305 = vsyncpa [#allocation4], 1 }

</bundles_post_ra>
